<compile_context>
chip_gen: v7x
topology: tpu7x:2x2x1
jax: 0.10.0
libtpu: 0.0.40
codegen_flags: <defaults>
</compile_context>

<pallas_src>
import math
import functools

import jax
import jax.numpy as jnp
from jax.experimental import pallas as pl
from jax.experimental.pallas import tpu as pltpu


_LANES = 128              # lane-dense last dim (full vreg lane width)
_CHUNK_ROWS = 512         # in-kernel reduction chunk (bounds live intermediates)
_MAX_TILE_ROWS = 8192     # 8192 x 128 x 4B = 4 MiB per input tile
_VMEM_LIMIT = 48 * 1024 * 1024   # explicit scoped-VMEM budget (fits v5e/v6e/v7x)


def _round_up(x, m):
    return ((x + m - 1) // m) * m


def _cdiv(a, b):
    return -(-a // b)


def _num_splits():
    # v7x has 2 TensorCores per chip; v5e/v6e have 1.  A size-2 split axis on a
    # 1-TC chip only adds grid-step overhead, so enable it for v7x only.
    try:
        kind = jax.devices()[0].device_kind.lower()
    except Exception:
        return 1
    return 2 if ("v7" in kind or "7x" in kind) else 1


def _jsd_kernel(p_ref, q_ref, out_ref, *, rows, tile_rows, chunk_rows,
                num_chunks, steps_per_split):
    s = pl.program_id(0)
    k = pl.program_id(1)

    @pl.when(k == 0)
    def _():
        out_ref[...] = jnp.zeros_like(out_ref)

    lanes = p_ref.shape[-1]
    # Global row offset of this tile.  Grid steps that land past the last valid
    # tile (possible only when the split axis is 2 and num_tiles is odd) have
    # their DMA clamped to the last tile by the index_map, while row0 >= rows
    # masks every element below, so they contribute exactly 0.
    row0 = (s * steps_per_split + k) * tile_rows
    local_row = jax.lax.broadcasted_iota(jnp.int32, (chunk_rows, 1), 0)
    tiny = jnp.finfo(jnp.float32).tiny

    def body(c, acc):
        r = pl.multiple_of(c * chunk_rows, 8)
        p = p_ref[pl.ds(r, chunk_rows), :].astype(jnp.float32)
        q = q_ref[pl.ds(r, chunk_rows), :].astype(jnp.float32)
        m = 0.5 * (p + q)
        # Two EUP logs per element instead of three:
        #   m*(log m - log p) + m*(log m - log q) = m*(2*log m - log(p*q))
        # p*q is clamped away from 0 so underflow cannot produce -inf.
        kl = m * (2.0 * jnp.log(m) - jnp.log(jnp.maximum(p * q, tiny)))
        # Row mask (ragged tail / out-of-bounds block rows) fused with the
        # m > 0 guard that matches PyTorch's xlogy handling.
        keep = ((row0 + r + local_row) < rows) & (m > 0.0)
        kl = jnp.where(keep, kl, 0.0)
        # Pure VPU adds: reshape regroups whole (8,128) vregs, no XLU reduce
        # and no scalar/SMEM dependency chain in the loop.
        return acc + jnp.sum(kl.reshape(chunk_rows // 8, 8, lanes), axis=0)

    acc = jax.lax.fori_loop(0, num_chunks, body,
                            jnp.zeros((8, lanes), jnp.float32))
    out_ref[...] += acc


def jsd(net_1_logits, net_2_logits, reduction="batchmean"):
    assert reduction == "batchmean"
    assert net_1_logits.shape == net_2_logits.shape
    shape = net_1_logits.shape
    batch = shape[0]
    total = math.prod(shape)
    scale = 0.5 / float(batch)   # 0.5 * (1/batch) from 'batchmean'

    rows = total // _LANES        # full 128-lane rows -> Pallas kernel
    rem = total - rows * _LANES   # <128-element flat tail -> plain jnp
    tiny = jnp.finfo(jnp.float32).tiny

    def _tail_sum():
        p = net_1_logits.reshape(-1)[rows * _LANES:].astype(jnp.float32)
        q = net_2_logits.reshape(-1)[rows * _LANES:].astype(jnp.float32)
        m = 0.5 * (p + q)
        kl = m * (2.0 * jnp.log(m) - jnp.log(jnp.maximum(p * q, tiny)))
        return jnp.sum(jnp.where(m > 0.0, kl, 0.0))

    if rows == 0:
        return scale * _tail_sum()

    num_splits = _num_splits()
    rows_per_split = _cdiv(rows, num_splits)
    if rows_per_split >= _CHUNK_ROWS:
        chunk_rows = _CHUNK_ROWS
        tile_rows = min(_MAX_TILE_ROWS, _round_up(rows_per_split, _CHUNK_ROWS))
    else:
        chunk_rows = _round_up(rows_per_split, 8)
        tile_rows = chunk_rows
    num_chunks = tile_rows // chunk_rows
    num_tiles = _cdiv(rows, tile_rows)
    steps_per_split = _cdiv(num_tiles, num_splits)

    # No host-side padding copy: flattening is a free reshape for contiguous
    # inputs; the (possible) partial last tile is masked inside the kernel.
    def _slab(x):
        x = x.reshape(-1)
        if rem:
            x = x[: rows * _LANES]
        return x.reshape(rows, _LANES)

    p2 = _slab(net_1_logits)
    q2 = _slab(net_2_logits)

    if num_splits * steps_per_split > num_tiles:
        # Clamp so no DMA block starts past the end of the slab; such grid
        # steps are fully row-masked in the kernel and contribute 0.
        in_map = lambda s, k: (jnp.minimum(s * steps_per_split + k,
                                           num_tiles - 1), 0)
    else:
        in_map = lambda s, k: (s * steps_per_split + k, 0)

    kernel = functools.partial(
        _jsd_kernel, rows=rows, tile_rows=tile_rows, chunk_rows=chunk_rows,
        num_chunks=num_chunks, steps_per_split=steps_per_split)

    # Plain 'parallel' may not actually shard across the two v7x TensorCores;
    # use CORE_PARALLEL for the split axis when it exists (size 2, v7x only).
    split_sem = pltpu.CORE_PARALLEL if num_splits > 1 else pltpu.ARBITRARY

    partials = pl.pallas_call(
        kernel,
        out_shape=jax.ShapeDtypeStruct((num_splits * 8, _LANES), jnp.float32),
        grid=(num_splits, steps_per_split),
        in_specs=[
            pl.BlockSpec((tile_rows, _LANES), in_map),
            pl.BlockSpec((tile_rows, _LANES), in_map),
        ],
        out_specs=pl.BlockSpec((8, _LANES), lambda s, k: (s, 0)),
        compiler_params=pltpu.CompilerParams(
            dimension_semantics=(split_sem, pltpu.ARBITRARY),
            vmem_limit_bytes=_VMEM_LIMIT),
    )(p2, q2)

    # Single tiny cross-lane reduction + scaling outside the kernel.
    loss = jnp.sum(partials)
    if rem:
        loss = loss + _tail_sum()
    return scale * loss


def _jsd_reference(p, q):
    batch = p.shape[0]
    m = 0.5 * (p + q)
    kl1 = jnp.sum(jnp.where(m > 0, m * (jnp.log(m) - jnp.log(p)), 0.0)) / batch
    kl2 = jnp.sum(jnp.where(m > 0, m * (jnp.log(m) - jnp.log(q)), 0.0)) / batch
    return 0.5 * (kl1 + kl2)


if __name__ == "__main__":
    key = jax.random.PRNGKey(0)
    k1, k2 = jax.random.split(key)
    # The torch module applies log() directly to its inputs, so they must be
    # positive probabilities; build them with a softmax over the last axis.
    shape = (2, 4, 16, 16)
    net_1 = jax.nn.softmax(jax.random.normal(k1, shape, dtype=jnp.float32), axis=-1)
    net_2 = jax.nn.softmax(jax.random.normal(k2, shape, dtype=jnp.float32), axis=-1)

    loss = jax.block_until_ready(jsd(net_1, net_2))
    ref = jax.block_until_ready(_jsd_reference(net_1, net_2))
    assert jnp.allclose(loss, ref, rtol=1e-5, atol=1e-5), (loss, ref)
    print("KERNEL_OK")
</pallas_src>

<mosaic_0001>
module attributes {stable_mosaic.version = 11 : i64} {
  func.func @_jsd_kernel(%arg0: i32, %arg1: i32, %arg2: memref<16x128xf32, #tpu.memory_space<vmem>>, %arg3: memref<16x128xf32, #tpu.memory_space<vmem>>, %arg4: memref<8x128xf32, #tpu.memory_space<vmem>>) attributes {dimension_semantics = [#tpu.dimension_semantics<arbitrary>, #tpu.dimension_semantics<arbitrary>], iteration_bounds = array<i64: 1, 1>, scalar_prefetch = 0 : i64, scratch_operands = 0 : i64, tpu.core_type = #tpu.core_type<tc>, window_params = [{transform_indices = @transform_0, window_bounds = array<i64: 16, 128>}, {transform_indices = @transform_1, window_bounds = array<i64: 16, 128>}, {transform_indices = @transform_2, window_bounds = array<i64: 8, 128>}]} {
    %c0_i32 = arith.constant 0 : i32
    %0 = arith.cmpi eq, %arg1, %c0_i32 : i32
    %1 = arith.extui %0 : i1 to i32
    %c0_i32_0 = arith.constant 0 : i32
    %2 = arith.cmpi ne, %1, %c0_i32_0 : i32
    scf.if %2 {
      %cst_16 = arith.constant 0.000000e+00 : f32
      %43 = vector.broadcast %cst_16 : f32 to vector<8x128xf32>
      %c0_17 = arith.constant 0 : index
      %c0_18 = arith.constant 0 : index
      %44 = vector.load %arg4[%c0_17, %c0_18] : memref<8x128xf32, #tpu.memory_space<vmem>>, vector<8x128xf32>
      tpu.vector_store %arg4[%c0_17, %c0_18], %43 {strides = array<i32>} : memref<8x128xf32, #tpu.memory_space<vmem>>, vector<8x128xf32>,
    } else {
    }
    %c1_i32 = arith.constant 1 : i32
    %3 = arith.muli %arg0, %c1_i32 : i32
    %4 = arith.addi %3, %arg1 : i32
    %c16_i32 = arith.constant 16 : i32
    %5 = arith.muli %4, %c16_i32 : i32
    %6 = tpu.iota {dimensions = array<i32: 0>} : vector<16x1xi32>
    %cst = arith.constant 0.000000e+00 : f32
    %7 = vector.broadcast %cst : f32 to vector<8x128xf32>
    %c0_i32_1 = arith.constant 0 : i32
    %c16_i32_2 = arith.constant 16 : i32
    %8 = arith.muli %c0_i32_1, %c16_i32_2 : i32
    %9 = tpu.assume_multiple %8, 8 : i32
    %10 = arith.index_cast %9 : i32 to index
    %c0 = arith.constant 0 : index
    %11 = vector.load %arg2[%10, %c0] : memref<16x128xf32, #tpu.memory_space<vmem>>, vector<16x128xf32>
    %12 = arith.index_cast %9 : i32 to index
    %c0_3 = arith.constant 0 : index
    %13 = vector.load %arg3[%12, %c0_3] : memref<16x128xf32, #tpu.memory_space<vmem>>, vector<16x128xf32>
    %14 = arith.addf %11, %13 : vector<16x128xf32>
    %cst_4 = arith.constant 5.000000e-01 : f32
    %15 = vector.broadcast %cst_4 : f32 to vector<16x128xf32>
    %16 = arith.mulf %15, %14 : vector<16x128xf32>
    %17 = math.log %16 : vector<16x128xf32>
    %cst_5 = arith.constant 2.000000e+00 : f32
    %18 = vector.broadcast %cst_5 : f32 to vector<16x128xf32>
    %19 = arith.mulf %18, %17 : vector<16x128xf32>
    %20 = arith.mulf %11, %13 : vector<16x128xf32>
    %cst_6 = arith.constant 1.17549435E-38 : f32
    %21 = vector.broadcast %cst_6 : f32 to vector<16x128xf32>
    %22 = arith.maximumf %20, %21 : vector<16x128xf32>
    %23 = math.log %22 : vector<16x128xf32>
    %24 = arith.subf %19, %23 : vector<16x128xf32>
    %25 = arith.mulf %16, %24 : vector<16x128xf32>
    %26 = arith.addi %5, %9 : i32
    %27 = vector.broadcast %26 : i32 to vector<16x1xi32>
    %28 = arith.addi %27, %6 : vector<16x1xi32>
    %c16_i32_7 = arith.constant 16 : i32
    %29 = vector.broadcast %c16_i32_7 : i32 to vector<16x1xi32>
    %30 = arith.cmpi slt, %28, %29 : vector<16x1xi32>
    %cst_8 = arith.constant 0.000000e+00 : f32
    %31 = vector.broadcast %cst_8 : f32 to vector<16x128xf32>
    %32 = arith.cmpf ogt, %16, %31 : vector<16x128xf32>
    %33 = vector.broadcast %30 : vector<16x1xi1> to vector<16x128xi1>
    %34 = arith.andi %33, %32 : vector<16x128xi1>
    %cst_9 = arith.constant 0.000000e+00 : f32
    %35 = vector.broadcast %cst_9 : f32 to vector<16x128xf32>
    %36 = arith.select %34, %25, %35 : vector<16x128xi1>, vector<16x128xf32>
    %37 = vector.shape_cast %36 : vector<16x128xf32> to vector<2x8x128xf32>
    %cst_10 = arith.constant dense<0.000000e+00> : vector<8x128xf32>
    %38 = vector.multi_reduction <add>, %37, %cst_10 [0] : vector<2x8x128xf32> to vector<8x128xf32>
    %39 = arith.addf %7, %38 : vector<8x128xf32>
    %c1_i32_11 = arith.constant 1 : i32
    %c0_12 = arith.constant 0 : index
    %c0_13 = arith.constant 0 : index
    %40 = vector.load %arg4[%c0_12, %c0_13] : memref<8x128xf32, #tpu.memory_space<vmem>>, vector<8x128xf32>
    %41 = arith.addf %40, %39 : vector<8x128xf32>
    %c0_14 = arith.constant 0 : index
    %c0_15 = arith.constant 0 : index
    %42 = vector.load %arg4[%c0_14, %c0_15] : memref<8x128xf32, #tpu.memory_space<vmem>>, vector<8x128xf32>
    tpu.vector_store %arg4[%c0_14, %c0_15], %41 {strides = array<i32>} : memref<8x128xf32, #tpu.memory_space<vmem>>, vector<8x128xf32>,
    return
  }
  func.func @transform_0(%arg0: i32, %arg1: i32) -> (i32, i32) {
    %c1_i32 = arith.constant 1 : i32
    %0 = arith.muli %arg0, %c1_i32 : i32
    %1 = arith.addi %0, %arg1 : i32
    %c0_i32 = arith.constant 0 : i32
    %c0_i32_0 = arith.constant 0 : i32
    return %1, %c0_i32 : i32, i32
  }
  func.func @transform_1(%arg0: i32, %arg1: i32) -> (i32, i32) {
    %c1_i32 = arith.constant 1 : i32
    %0 = arith.muli %arg0, %c1_i32 : i32
    %1 = arith.addi %0, %arg1 : i32
    %c0_i32 = arith.constant 0 : i32
    %c0_i32_0 = arith.constant 0 : i32
    return %1, %c0_i32 : i32, i32
  }
  func.func @transform_2(%arg0: i32, %arg1: i32) -> (i32, i32) {
    %c0_i32 = arith.constant 0 : i32
    %c0_i32_0 = arith.constant 0 : i32
    return %arg0, %c0_i32 : i32, i32
  }
}

</mosaic_0001>

<bundles_post_ra>
// kernel: tpu_custom_call.1
= control target key start
LH: loop header
LB: loop body
LE: loop exit
PB: predicated region body
PF: predicated region fallthrough
CT: control target
= control target key end

     0   :  { %7 = vsyncpa [#allocation3], 0  ;;  %s267_s0 = inlined_call_operand.hbm [shape: f32[16,128], index: 0, kind: input, shape index: {}]   ;;  %s268_s1 = inlined_call_operand.hbm [shape: f32[16,128], index: 1, kind: input, shape index: {}]   ;;  %s269_s2 = inlined_call_operand.hbm [shape: f32[8,128], index: 2, kind: output, shape index: {}]  }
   0x1   :  { %8 = vsyncpa [#allocation6], 0 }
   0x2   :  { %9 = vsyncpa [#allocation4], 0  ;;  %s211_s9 = smov [#allocation2]   ;;  %s139_s13 = scalar_lea.hbm %s267_s0, 256 }
   0x3   :  { %s19_s10 = sshll.u32 %s211_s9, 4  ;;  %p140_p0 = scmp.ne.s32.totalorder %s267_s0, %s139_s13  ;;  %s20_s10 = int_to_ptr.vmem [resolvable:$true] %s19_s10 }
   0x4   :  { %p143_p1 = scmp.lt.u32.totalorder %s139_s13, %s267_s0 }
   0x6   :  { %p145_p2 = pnand %p143_p1, %p140_p0 }
   0x8   :  { %148 = shalt.err (!%p145_p2)
}
   0x9   :  { %s149_s18 = scalar_lea.vmem %s20_s10, 256  ;;  %p154_p4 = scmp.lt.s32.totalorder %s20_s10, %s20_s10 }
   0xa   :  { %p150_p3 = scmp.ne.s32.totalorder %s20_s10, %s149_s18  ;;  %p155_p5 = scmp.lt.s32.totalorder %s149_s18, %s149_s18 }
   0xc   :  { %p156_p6 = por %p155_p5, %p154_p4 }
   0xe   :  { %p157_p7 = pnand %p156_p6, %p150_p3 }
  0x10   :  { %160 = shalt.err (!%p157_p7)
}
  0x11   :  { %s212_s19 = smov 128   ;;  %s213_s20 = smov 8  }
  0x12   :  { %25 = dma.hbm_to_vmem [thread:$0]  %s267_s0, 256, %s20_s10, [#allocation3], %s212_s19, %s212_s19, %s213_s20  }
  0x13   :  { %s214_s23 = smov [#allocation5]   ;;  %s161_s27 = scalar_lea.hbm %s268_s1, 256 }
  0x14   :  { %s35_s24 = sshll.u32 %s214_s23, 4  ;;  %p162_p8 = scmp.ne.s32.totalorder %s268_s1, %s161_s27  ;;  %s36_s24 = int_to_ptr.vmem [resolvable:$true] %s35_s24 }
  0x15   :  { %p165_p9 = scmp.lt.u32.totalorder %s161_s27, %s268_s1 }
  0x17   :  { %p167_p10 = pnand %p165_p9, %p162_p8 }
  0x19   :  { %170 = shalt.err (!%p167_p10)
}
  0x1a   :  { %s171_s4 = scalar_lea.vmem %s36_s24, 256  ;;  %p176_p12 = scmp.lt.s32.totalorder %s36_s24, %s36_s24 }
  0x1b   :  { %p172_p11 = scmp.ne.s32.totalorder %s36_s24, %s171_s4  ;;  %p177_p13 = scmp.lt.s32.totalorder %s171_s4, %s171_s4 }
  0x1d   :  { %p178_p0 = por %p177_p13, %p176_p12 }
  0x1f   :  { %p179_p1 = pnand %p178_p0, %p172_p11 }
  0x21   :  { %182 = shalt.err (!%p179_p1)
}
  0x22   :  { %41 = dma.hbm_to_vmem [thread:$0]  %s268_s1, 256, %s36_s24, [#allocation6], %s212_s19, %s212_s19, %s213_s20  }
  0x23   :  { %205 = dma.done.wait [#allocation3], 256  }
  0x24   :  { %206 = vsyncadd [#allocation3], 4294967040 }
  0x25   :  { %207 = dma.done.wait [#allocation6], 256  }
  0x26   :  { %208 = vsyncadd [#allocation6], 4294967040  ;;  %v62_v0 = vld [vmem:[#allocation2] sm:$0xff]  ;;  %v63_v1 = vld [vmem:[#allocation2 + $0x8] sm:$0xff]  ;;  %s215_s1 = smov [#allocation7]  }
  0x27   :  { %v64_v2 = vld [vmem:[#allocation5] sm:$0xff]  ;;  %v65_v3 = vld [vmem:[#allocation5 + $0x8] sm:$0xff]  ;;  %s115_s6 = sshll.u32 %s215_s1, 4  ;;  %s116_s6 = int_to_ptr.vmem [resolvable:$true] %s115_s6 }
  0x28   :  { %v66_v4 = vadd.f32 %v64_v2, %v62_v0  ;;  %v76_v5 = vmul.f32 %v64_v2, %v62_v0  ;;  %v67_v6 = vadd.f32 %v65_v3, %v63_v1  ;;  %v77_v7 = vmul.f32 %v65_v3, %v63_v1  ;;  %s183_s7 = scalar_lea.vmem %s116_s6, 128  ;;  %p188_p3 = scmp.lt.s32.totalorder %s116_s6, %s116_s6 }
  0x29   :  { %p184_p2 = scmp.ne.s32.totalorder %s116_s6, %s183_s7  ;;  %p189_p4 = scmp.lt.s32.totalorder %s183_s7, %s183_s7 }
  0x2a   :  { %v68_v8 = vmul.f32 0.5, %v66_v4  ;;  %v78_v9 = vmax.f32 %v76_v5, 1.1754944e-38  ;;  %v69_v10 = vmul.f32 0.5, %v67_v6  ;;  %v79_v11 = vmax.f32 %v77_v7, 1.1754944e-38 }
  0x2b   :  { %p190_p5 = por %p189_p4, %p188_p3 }
  0x2c   :  { %131 = vlog2.f32 %v68_v8  ;;  %vm94_vm0 = vcmp.gt.f32.partialorder %v68_v8, 0.0  ;;  %vm95_vm1 = vcmp.gt.f32.partialorder %v69_v10, 0.0 }
  0x2d   :  { %133 = vlog2.f32 %v69_v10  ;;  %p191_p6 = pnand %p190_p5, %p184_p2 }
  0x2e   :  { %135 = vlog2.f32 %v78_v9 }
  0x2f   :  { %137 = vlog2.f32 %v79_v11 }
  0x36   :  { %v132_v12 = vpop.eup %131 }
  0x37   :  { %v134_v13 = vpop.eup %133  ;;  %v71_v14 = vmul.f32 0.6931472, %v132_v12 }
  0x38   :  { %v136_v15 = vpop.eup %135  ;;  %v73_v16 = vmul.f32 0.6931472, %v134_v13 }
  0x39   :  { %v138_v17 = vpop.eup %137  ;;  %v74_v18 = vmul.f32 2.0, %v71_v14  ;;  %v81_v19 = vmul.f32 0.6931472, %v136_v15 }
  0x3a   :  { %v75_v20 = vmul.f32 2.0, %v73_v16  ;;  %v83_v21 = vmul.f32 0.6931472, %v138_v17 }
  0x3b   :  { %v84_v22 = vsub.f32 %v74_v18, %v81_v19 }
  0x3c   :  { %v85_v23 = vsub.f32 %v75_v20, %v83_v21 }
  0x3d   :  { %v86_v24 = vmul.f32 %v84_v22, %v68_v8 }
  0x3e   :  { %v87_v25 = vmul.f32 %v85_v23, %v69_v10 }
  0x3f   :  { %v102_v26 = vsel %vm94_vm0, %v86_v24, 0.0 }
  0x40   :  { %v103_v27 = vsel %vm95_vm1, %v87_v25, 0.0 }
  0x41   :  { %v104_v28 = vadd.f32 %v103_v27, %v102_v26 }
  0x43   :  { %108 = vst [vmem:[#allocation7] sm:$0xff] %v104_v28 }
  0x44   :  { %194 = shalt.err (!%p191_p6)
}
  0x45   :  { %s195_s10 = scalar_lea.hbm %s269_s2, 128 }
  0x46   :  { %p196_p7 = scmp.ne.s32.totalorder %s269_s2, %s195_s10  ;;  %p199_p8 = scmp.lt.u32.totalorder %s195_s10, %s269_s2 }
  0x48   :  { %p201_p9 = pnand %p199_p8, %p196_p7 }
  0x4a   :  { %204 = shalt.err (!%p201_p9)
}
  0x4b   :  { %118 = dma.vmem_to_hbm [thread:$0]  %s116_s6, 128, %s269_s2, [#allocation4]  }
  0x4c   :  { %209 = dma.done.wait [#allocation4], 128  }
  0x4d   :  { %210 = vsyncadd [#allocation4], 4294967168 }
  0x4e   :  { %122 = vsyncpa [#allocation3], 1 }
  0x4f   :  { %123 = vsyncpa [#allocation6], 1 }
  0x50   :  { %124 = vsyncpa [#allocation4], 1 }

</bundles_post_ra>
